<compile_context>
chip_gen: v5e
topology: v5e:2x2
jax: 0.10.0
libtpu: 0.0.40
codegen_flags: <defaults>
</compile_context>

<pallas_src>
import functools

import jax
import jax.numpy as jnp
from jax.experimental import pallas as pl
from jax.experimental.pallas import tpu as pltpu


HIDDEN = 16   # "output_dim" in the PyTorch module
LANE = 128    # TPU lane width


def _round_up(x, m):
    return ((x + m - 1) // m) * m


def _cdiv(a, b):
    return -(-a // b)


# ---------------------------------------------------------------------------
# Kernel
# ---------------------------------------------------------------------------
def coupling_kernel(xT_ref, w1_ref, wmid_ref, w5_ref, t_ref, s_ref):
    """Fused two-branch MLP on a transposed (features+1, batch_tile) block.

    xT_ref  : (F+1, Bt)        input slab, batch on lanes; last row is all-ones
    w1_ref  : (2H+1, F+1)      [[tW1 tb1],[sW1 sb1],[0...0 1]]
    wmid_ref: (3, 2H+1, 2H+1)  block-diag(tWi, sWi) + bias column + pass-through
    w5_ref  : (2F, 2H+1)       block-diag(tW5, sW5) + bias column
    t_ref   : (F, Bt)          t-branch output
    s_ref   : (F, Bt)          s-branch output (tanh applied)
    """
    F = t_ref.shape[0]
    cdt = w1_ref.dtype  # MXU operand dtype (bf16 by default, f32 accumulation)

    # layer 1 (bias folded via the ones row carried in xT)
    h = jnp.dot(w1_ref[...], xT_ref[...], preferred_element_type=jnp.float32)
    h = jnp.maximum(h, 0.0).astype(cdt)          # pass-through row stays exactly 1

    # layers 2..4 (block-diagonal fused; biases + pass-through folded into weights)
    for k in range(3):
        h = jnp.dot(wmid_ref[k], h, preferred_element_type=jnp.float32)
        h = jnp.maximum(h, 0.0).astype(cdt)

    # layer 5: single fused (2F, 2H+1) matmul, no ReLU; tanh only on the s rows.
    out = jnp.dot(w5_ref[...], h, preferred_element_type=jnp.float32)
    t_ref[...] = out[:F, :].astype(t_ref.dtype)
    s_ref[...] = jnp.tanh(out[F:, :]).astype(s_ref.dtype)


# ---------------------------------------------------------------------------
# Wrapper
# ---------------------------------------------------------------------------
@functools.partial(jax.jit, static_argnames=("batch_tile",))
def coupling_forward(x, packed_params, *, batch_tile=16384):
    """Pallas-backed forward. x: (batch, F) -> (s, t), each (batch, F)."""
    w1a, wmid_a, w5a = packed_params
    B, F = x.shape
    cdt = w1a.dtype

    # --- batch tiling: lane-align only (<=127 pad cols), big tiles, >=2 steps ---
    b_pad = _round_up(max(B, 1), LANE)
    nblk = b_pad // LANE
    cap_blk = max(1, min(batch_tile, b_pad) // LANE)
    if nblk >= 2:
        cap_blk = min(cap_blk, _cdiv(nblk, 2))   # >=2 grid steps -> v7x megacore
    divisors = [d for d in range(1, cap_blk + 1) if nblk % d == 0]
    tile_blk = max(divisors)
    if tile_blk * 4 < cap_blk:                   # only tiny divisors -> accept a
        tile_blk = cap_blk                       # partial edge block instead
    tile = tile_blk * LANE
    grid = (_cdiv(nblk, tile_blk),)

    # (F+1, b_pad): batch on lanes; the padded extra row is the constant "ones"
    # row that feeds the folded biases.  Pad value 1.0 also lands in the unused
    # batch columns, which are discarded below (never mixed across columns).
    xT = jnp.pad(x.T.astype(cdt), ((0, 1), (0, b_pad - B)), constant_values=1.0)

    # VMEM headroom only needed for very large tiles (default tile is ~3 MiB).
    bytes_per_col = (F + 1) * jnp.dtype(cdt).itemsize + 2 * F * jnp.dtype(x.dtype).itemsize
    w_bytes = sum(int(w.size) * jnp.dtype(w.dtype).itemsize for w in (w1a, wmid_a, w5a))
    vmem_need = 2 * tile * bytes_per_col + 2 * w_bytes + (1 << 20)
    cp_kwargs = {"dimension_semantics": ("parallel",)}
    if vmem_need > (12 << 20):                   # exceeds v5e's 16 MiB default scope
        cp_kwargs["vmem_limit_bytes"] = min(vmem_need + (8 << 20), 56 << 20)

    const2 = lambda i: (0, 0)
    # NOTE: weight specs use constant index_maps so Pallas keeps them VMEM-resident
    # across the batch grid (no re-DMA).  Single-buffering them is a negligible win
    # here (weights are ~10 KiB total), so we keep default pipelining.
    t_out, s_out = pl.pallas_call(
        coupling_kernel,
        out_shape=(jax.ShapeDtypeStruct((F, b_pad), x.dtype),
                   jax.ShapeDtypeStruct((F, b_pad), x.dtype)),
        grid=grid,
        in_specs=[
            pl.BlockSpec((F + 1, tile), lambda i: (0, i)),    # x^T, tiled on batch
            pl.BlockSpec(w1a.shape, const2),                  # weights: resident
            pl.BlockSpec(wmid_a.shape, lambda i: (0, 0, 0)),
            pl.BlockSpec(w5a.shape, const2),
        ],
        out_specs=(pl.BlockSpec((F, tile), lambda i: (0, i)),
                   pl.BlockSpec((F, tile), lambda i: (0, i))),
        compiler_params=pltpu.CompilerParams(**cp_kwargs),
    )(xT, w1a, wmid_a, w5a)

    # TODO(synk): callers that can consume/produce the (features, batch) layout
    # directly should skip these transposes (they are the remaining wrapper copies).
    t = t_out[:, :B].T
    s = s_out[:, :B].T
    return s, t


# ---------------------------------------------------------------------------
# Parameter init (PyTorch nn.Linear style) and fused packing
# ---------------------------------------------------------------------------
def init_coupling_params(key, input_shape, hidden=HIDDEN, dtype=jnp.float32):
    """Returns (t_params, s_params): lists of 5 (W, b), W stored (out, in)."""
    layer_dims = [
        (hidden, input_shape),
        (hidden, hidden),
        (hidden, hidden),
        (hidden, hidden),
        (input_shape, hidden),
    ]
    branches = []
    for _ in range(2):  # t-branch, s-branch
        layers = []
        for (fan_out, fan_in) in layer_dims:
            key, kw, kb = jax.random.split(key, 3)
            bound = 1.0 / float(fan_in) ** 0.5
            w = jax.random.uniform(kw, (fan_out, fan_in), dtype, -bound, bound)
            b = jax.random.uniform(kb, (fan_out,), dtype, -bound, bound)
            layers.append((w, b))
        branches.append(layers)
    return branches[0], branches[1]


def pack_coupling_params(t_params, s_params, compute_dtype=jnp.bfloat16):
    """Fuse both branches + all biases into the 3 arrays consumed by the kernel.

    Biases are folded into the weights via an augmented ones row (last row of the
    kernel's activations), so the kernel never does an explicit bias add.
    """
    tW = [w for w, _ in t_params]
    tb = [b for _, b in t_params]
    sW = [w for w, _ in s_params]
    sb = [b for _, b in s_params]
    H = tW[1].shape[0]
    F = tW[0].shape[1]
    f32 = tW[0].dtype

    col = lambda v: v.reshape(-1, 1)

    # layer 1: (2H+1, F+1) = [[tW1 tb1],[sW1 sb1],[0...0 1]]
    top = jnp.concatenate([
        jnp.concatenate([tW[0], col(tb[0])], axis=1),
        jnp.concatenate([sW[0], col(sb[0])], axis=1)], axis=0)
    passthru = jnp.zeros((1, F + 1), f32).at[0, F].set(1.0)
    w1a = jnp.concatenate([top, passthru], axis=0).astype(compute_dtype)

    # layers 2..4: (3, 2H+1, 2H+1) block-diagonal + bias column + pass-through row
    zH = jnp.zeros((H, H), f32)
    def mid(i):
        return jnp.block([
            [tW[i], zH, col(tb[i])],
            [zH, sW[i], col(sb[i])],
            [jnp.zeros((1, 2 * H), f32), jnp.ones((1, 1), f32)]])
    wmid_a = jnp.stack([mid(i) for i in (1, 2, 3)], axis=0).astype(compute_dtype)

    # layer 5: (2F, 2H+1) block-diagonal + bias column (no pass-through needed)
    zF = jnp.zeros((F, H), f32)
    w5a = jnp.block([
        [tW[4], zF, col(tb[4])],
        [zF, sW[4], col(sb[4])]]).astype(compute_dtype)

    return w1a, wmid_a, w5a


# ---------------------------------------------------------------------------
# References
# ---------------------------------------------------------------------------
def coupling_forward_ref(x, t_params, s_params):
    """Plain-JAX f32 reference matching PyTorch semantics: h = x @ W.T + b."""
    def mlp(h, params):
        for i, (w, b) in enumerate(params):
            h = h @ w.T + b
            if i < len(params) - 1:
                h = jnp.maximum(h, 0.0)
        return h
    return jnp.tanh(mlp(x, s_params)), mlp(x, t_params)


def coupling_forward_ref_bf16(x, t_params, s_params):
    """Reference emulating the kernel's numerics: bf16 MXU operands, f32 accum."""
    def mlp(h, params):
        for i, (w, b) in enumerate(params):
            h = jnp.dot(h.astype(jnp.bfloat16), w.T.astype(jnp.bfloat16),
                        preferred_element_type=jnp.float32)
            h = h + b.astype(jnp.bfloat16).astype(jnp.float32)
            if i < len(params) - 1:
                h = jnp.maximum(h, 0.0)
        return h
    return jnp.tanh(mlp(x, s_params)), mlp(x, t_params)


if __name__ == "__main__":
    key = jax.random.PRNGKey(0)
    k_params, k_x = jax.random.split(key)

    batch = 100        # deliberately not lane-aligned to exercise padding
    input_shape = 8    # feature dimension of the coupling layer

    t_params, s_params = init_coupling_params(k_params, input_shape)
    packed = pack_coupling_params(t_params, s_params)
    x = jax.random.normal(k_x, (batch, input_shape), dtype=jnp.float32)

    s, t = coupling_forward(x, packed)
    jax.block_until_ready((s, t))

    assert s.shape == (batch, input_shape) and t.shape == (batch, input_shape)

    # Tight check against a reference that reproduces the kernel's bf16-operand /
    # f32-accumulation math (validates the fused/folded-bias implementation).
    s_bf, t_bf = coupling_forward_ref_bf16(x, t_params, s_params)
    assert jnp.allclose(s, s_bf, atol=2e-3, rtol=2e-3), \
        float(jnp.max(jnp.abs(s - s_bf)))
    assert jnp.allclose(t, t_bf, atol=2e-3, rtol=2e-3), \
        float(jnp.max(jnp.abs(t - t_bf)))

    # Sanity check against the full-f32 PyTorch-semantics reference (bf16 MXU
    # operands trade ~1e-2 absolute error for ~3x fewer MXU passes).
    s_ref, t_ref = coupling_forward_ref(x, t_params, s_params)
    assert jnp.allclose(s, s_ref, atol=5e-2, rtol=5e-2), \
        float(jnp.max(jnp.abs(s - s_ref)))
    assert jnp.allclose(t, t_ref, atol=5e-2, rtol=5e-2), \
        float(jnp.max(jnp.abs(t - t_ref)))

    print("KERNEL_OK")
</pallas_src>

<mosaic_0001>
module attributes {stable_mosaic.version = 11 : i64} {
  func.func @coupling_kernel(%arg0: i32, %arg1: memref<9x128xbf16, #tpu.memory_space<vmem>>, %arg2: memref<33x9xbf16, #tpu.memory_space<vmem>>, %arg3: memref<3x33x33xbf16, #tpu.memory_space<vmem>>, %arg4: memref<16x33xbf16, #tpu.memory_space<vmem>>, %arg5: memref<8x128xf32, #tpu.memory_space<vmem>>, %arg6: memref<8x128xf32, #tpu.memory_space<vmem>>) attributes {dimension_semantics = [#tpu.dimension_semantics<parallel>], iteration_bounds = array<i64: 1>, scalar_prefetch = 0 : i64, scratch_operands = 0 : i64, tpu.core_type = #tpu.core_type<tc>, window_params = [{transform_indices = @transform_0, window_bounds = array<i64: 9, 128>}, {pipeline_mode = #tpu.pipeline_mode<synchronous>, transform_indices = @transform_1, window_bounds = array<i64: 33, 9>}, {pipeline_mode = #tpu.pipeline_mode<synchronous>, transform_indices = @transform_2, window_bounds = array<i64: 3, 33, 33>}, {pipeline_mode = #tpu.pipeline_mode<synchronous>, transform_indices = @transform_3, window_bounds = array<i64: 16, 33>}, {transform_indices = @transform_4, window_bounds = array<i64: 8, 128>}, {transform_indices = @transform_5, window_bounds = array<i64: 8, 128>}]} {
    %c0 = arith.constant 0 : index
    %c0_0 = arith.constant 0 : index
    %0 = vector.load %arg2[%c0, %c0_0] : memref<33x9xbf16, #tpu.memory_space<vmem>>, vector<33x9xbf16>
    %c0_1 = arith.constant 0 : index
    %c0_2 = arith.constant 0 : index
    %1 = vector.load %arg1[%c0_1, %c0_2] : memref<9x128xbf16, #tpu.memory_space<vmem>>, vector<9x128xbf16>
    %cst = arith.constant dense<0.000000e+00> : vector<33x128xf32>
    %2 = tpu.matmul %0, %1, %cst {dimension_numbers = #tpu.dot_dimension_numbers<[1], [0], [0], [1], [0, 0, 1, 1], [], []>} : vector<33x9xbf16>, vector<9x128xbf16>, vector<33x128xf32> -> vector<33x128xf32>
    %cst_3 = arith.constant 0.000000e+00 : f32
    %3 = vector.broadcast %cst_3 : f32 to vector<33x128xf32>
    %4 = arith.maximumf %2, %3 : vector<33x128xf32>
    %5 = arith.truncf %4 : vector<33x128xf32> to vector<33x128xbf16>
    %c0_4 = arith.constant 0 : index
    %c0_5 = arith.constant 0 : index
    %c0_6 = arith.constant 0 : index
    %6 = vector.load %arg3[%c0_4, %c0_5, %c0_6] : memref<3x33x33xbf16, #tpu.memory_space<vmem>>, vector<1x33x33xbf16>
    %7 = vector.shape_cast %6 : vector<1x33x33xbf16> to vector<33x33xbf16>
    %cst_7 = arith.constant dense<0.000000e+00> : vector<33x128xf32>
    %8 = tpu.matmul %7, %5, %cst_7 {dimension_numbers = #tpu.dot_dimension_numbers<[1], [0], [0], [1], [0, 0, 1, 1], [], []>} : vector<33x33xbf16>, vector<33x128xbf16>, vector<33x128xf32> -> vector<33x128xf32>
    %cst_8 = arith.constant 0.000000e+00 : f32
    %9 = vector.broadcast %cst_8 : f32 to vector<33x128xf32>
    %10 = arith.maximumf %8, %9 : vector<33x128xf32>
    %11 = arith.truncf %10 : vector<33x128xf32> to vector<33x128xbf16>
    %c1 = arith.constant 1 : index
    %c0_9 = arith.constant 0 : index
    %c0_10 = arith.constant 0 : index
    %12 = vector.load %arg3[%c1, %c0_9, %c0_10] : memref<3x33x33xbf16, #tpu.memory_space<vmem>>, vector<1x33x33xbf16>
    %13 = vector.shape_cast %12 : vector<1x33x33xbf16> to vector<33x33xbf16>
    %cst_11 = arith.constant dense<0.000000e+00> : vector<33x128xf32>
    %14 = tpu.matmul %13, %11, %cst_11 {dimension_numbers = #tpu.dot_dimension_numbers<[1], [0], [0], [1], [0, 0, 1, 1], [], []>} : vector<33x33xbf16>, vector<33x128xbf16>, vector<33x128xf32> -> vector<33x128xf32>
    %cst_12 = arith.constant 0.000000e+00 : f32
    %15 = vector.broadcast %cst_12 : f32 to vector<33x128xf32>
    %16 = arith.maximumf %14, %15 : vector<33x128xf32>
    %17 = arith.truncf %16 : vector<33x128xf32> to vector<33x128xbf16>
    %c2 = arith.constant 2 : index
    %c0_13 = arith.constant 0 : index
    %c0_14 = arith.constant 0 : index
    %18 = vector.load %arg3[%c2, %c0_13, %c0_14] : memref<3x33x33xbf16, #tpu.memory_space<vmem>>, vector<1x33x33xbf16>
    %19 = vector.shape_cast %18 : vector<1x33x33xbf16> to vector<33x33xbf16>
    %cst_15 = arith.constant dense<0.000000e+00> : vector<33x128xf32>
    %20 = tpu.matmul %19, %17, %cst_15 {dimension_numbers = #tpu.dot_dimension_numbers<[1], [0], [0], [1], [0, 0, 1, 1], [], []>} : vector<33x33xbf16>, vector<33x128xbf16>, vector<33x128xf32> -> vector<33x128xf32>
    %cst_16 = arith.constant 0.000000e+00 : f32
    %21 = vector.broadcast %cst_16 : f32 to vector<33x128xf32>
    %22 = arith.maximumf %20, %21 : vector<33x128xf32>
    %23 = arith.truncf %22 : vector<33x128xf32> to vector<33x128xbf16>
    %c0_17 = arith.constant 0 : index
    %c0_18 = arith.constant 0 : index
    %24 = vector.load %arg4[%c0_17, %c0_18] : memref<16x33xbf16, #tpu.memory_space<vmem>>, vector<16x33xbf16>
    %cst_19 = arith.constant dense<0.000000e+00> : vector<16x128xf32>
    %25 = tpu.matmul %24, %23, %cst_19 {dimension_numbers = #tpu.dot_dimension_numbers<[1], [0], [0], [1], [0, 0, 1, 1], [], []>} : vector<16x33xbf16>, vector<33x128xbf16>, vector<16x128xf32> -> vector<16x128xf32>
    %26 = vector.extract_strided_slice %25 {offsets = [0, 0], sizes = [8, 128], strides = [1, 1]} : vector<16x128xf32> to vector<8x128xf32>
    %c0_20 = arith.constant 0 : index
    %c0_21 = arith.constant 0 : index
    %27 = vector.load %arg5[%c0_20, %c0_21] : memref<8x128xf32, #tpu.memory_space<vmem>>, vector<8x128xf32>
    tpu.vector_store %arg5[%c0_20, %c0_21], %26 {strides = array<i32>} : memref<8x128xf32, #tpu.memory_space<vmem>>, vector<8x128xf32>,
    %28 = vector.extract_strided_slice %25 {offsets = [8, 0], sizes = [8, 128], strides = [1, 1]} : vector<16x128xf32> to vector<8x128xf32>
    %29 = math.tanh %28 : vector<8x128xf32>
    %c0_22 = arith.constant 0 : index
    %c0_23 = arith.constant 0 : index
    %30 = vector.load %arg6[%c0_22, %c0_23] : memref<8x128xf32, #tpu.memory_space<vmem>>, vector<8x128xf32>
    tpu.vector_store %arg6[%c0_22, %c0_23], %29 {strides = array<i32>} : memref<8x128xf32, #tpu.memory_space<vmem>>, vector<8x128xf32>,
    return
  }
  func.func @transform_0(%arg0: i32) -> (i32, i32) {
    %c0_i32 = arith.constant 0 : i32
    %c0_i32_0 = arith.constant 0 : i32
    return %c0_i32, %arg0 : i32, i32
  }
  func.func @transform_1(%arg0: i32) -> (i32, i32) {
    %c0_i32 = arith.constant 0 : i32
    %c0_i32_0 = arith.constant 0 : i32
    %c0_i32_1 = arith.constant 0 : i32
    return %c0_i32, %c0_i32_0 : i32, i32
  }
  func.func @transform_2(%arg0: i32) -> (i32, i32, i32) {
    %c0_i32 = arith.constant 0 : i32
    %c0_i32_0 = arith.constant 0 : i32
    %c0_i32_1 = arith.constant 0 : i32
    %c0_i32_2 = arith.constant 0 : i32
    return %c0_i32, %c0_i32_0, %c0_i32_1 : i32, i32, i32
  }
  func.func @transform_3(%arg0: i32) -> (i32, i32) {
    %c0_i32 = arith.constant 0 : i32
    %c0_i32_0 = arith.constant 0 : i32
    %c0_i32_1 = arith.constant 0 : i32
    return %c0_i32, %c0_i32_0 : i32, i32
  }
  func.func @transform_4(%arg0: i32) -> (i32, i32) {
    %c0_i32 = arith.constant 0 : i32
    %c0_i32_0 = arith.constant 0 : i32
    return %c0_i32, %arg0 : i32, i32
  }
  func.func @transform_5(%arg0: i32) -> (i32, i32) {
    %c0_i32 = arith.constant 0 : i32
    %c0_i32_0 = arith.constant 0 : i32
    return %c0_i32, %arg0 : i32, i32
  }
}

</mosaic_0001>

<bundles_post_ra>
// kernel: coupling_forward.1
= control target key start
LH: loop header
LB: loop body
LE: loop exit
PB: predicated region body
PF: predicated region fallthrough
CT: control target
= control target key end

     0   :  { %11 = vsyncpa [#allocation3], 0  ;;  %s433_s21 = smov [#allocation2]   ;;  %s434_s23 = smov 64   ;;  %s511_s0 = inlined_call_operand.vmem [shape: bf16[9,128], index: 0, kind: input, shape index: {}]   ;;  %s512_s1 = inlined_call_operand.vmem [shape: bf16[33,9], index: 1, kind: input, shape index: {}]   ;;  %s513_s2 = inlined_call_operand.hbm [shape: bf16[3,33,33], index: 2, kind: input, shape index: {}]   ;;  %s514_s3 = inlined_call_operand.vmem [shape: bf16[16,33], index: 3, kind: input, shape index: {}]   ;;  %s515_s4 = inlined_call_operand.vmem [shape: f32[8,128], index: 4, kind: output, shape index: {0}]   ;;  %s516_s5 = inlined_call_operand.vmem [shape: f32[8,128], index: 5, kind: output, shape index: {1}]  }
   0x1   :  { %s20_s20 = sshll.u32 %s513_s2, 4  ;;  %s22_s22 = sshll.u32 %s433_s21, 4  ;;  %s21_s20 = int_to_ptr.hbm [resolvable:$true] %s20_s20  ;;  %s23_s22 = int_to_ptr.vmem [resolvable:$true] %s22_s22 }
   0x2   :  { %s435_s24 = smov 4  }
   0x3   :  { %28 = dma.hbm_to_vmem [thread:$0]  %s21_s20, 960, %s23_s22, [#allocation3], %s434_s23, %s434_s23, %s435_s24  }
   0x4   :  { %431 = dma.done.wait [#allocation3], 960  }
   0x5   :  { %432 = vsyncadd [#allocation3], 4294966336  ;;  %vm71_vm0 = vcmask 1043456   ;;  %vm72_vm1 = vcmask 1044480   ;;  %v436_v0 = vmov 65535   ;;  %v390_v7 = vld [vmem:[%s512_s1] sm:$0xff] }
   0x6   :  { %v73_v1 = vsel %vm71_vm0, 4294967295, %v436_v0  ;;  %v347_v2 = vld [vmem:[%s511_s0] sm:$0xf]  ;;  %v392_v3 = vld [vmem:[%s511_s0] sm:$0x10]  ;;  %vm61_vm2 = vcmask 72704  }
   0x7   :  { %v74_v4 = vsel %vm72_vm1, %v73_v1, 0  ;;  %v348_v5 = vor.u32 %v392_v3, %v347_v2  ;;  %v391_v8 = vld [vmem:[%s512_s1 + $0x8] sm:$0xff]  ;;  %v40_v9 = vld [vmem:[%s512_s1 + $0x10] sm:$0x1]  ;;  %vm137_vm3 = vcmask 1040384   ;;  %v437_v18 = vmov 0  }
   0x8   :  { %v52_v10 = vunpack.c.l.b16 %v40_v9  ;;  %v486_v19 = vsel %vm137_vm3, 65535, %v437_v18  ;;  %v393_v29 = vld [vmem:[#allocation2] sm:$0xff]  ;;  %vm127_vm4 = vcmask 269312   ;;  %v394_v30 = vld [vmem:[#allocation2 + $0x8] sm:$0xff]  ;;  %v113_v31 = vld [vmem:[#allocation2 + $0x10] sm:$0x1] }
   0x9   :  { %v76_v6 = vand.u32 %v348_v5, %v74_v4  ;;  %v123_v32 = vunpack.c.l.b16 %v113_v31  ;;  %v395_v49 = vld [vmem:[#allocation2 + $0x14] sm:$0xff]  ;;  %v396_v50 = vld [vmem:[#allocation2 + $0x1c] sm:$0xff]  ;;  %v179_v51 = vld [vmem:[#allocation2 + $0x24] sm:$0x1] }
   0xa   :  { %v55_v11 = vpack.c.b16 %v52_v10, %v52_v10  ;;  %v189_v52 = vunpack.c.l.b16 %v179_v51  ;;  %v397_v5 = vld [vmem:[#allocation2 + $0x28] sm:$0xff] }
   0xb   :  { %85 = vmatpush.bf16.msra.mxu0 %v76_v6  ;;  %v126_v33 = vpack.c.b16 %v123_v32, %v123_v32  ;;  %v398_v6 = vld [vmem:[#allocation2 + $0x30] sm:$0xff] }
   0xc   :  { %v192_v53 = vpack.c.b16 %v189_v52, %v189_v52 }
   0xe   :  { %349 = vmatmul.msk.bf16.vlgmr.msra.gmra.mxu0 %vm61_vm2, %v390_v7  ;;  %v241_v7 = vld [vmem:[#allocation2 + $0x38] sm:$0x1] }
  0x1e   :  { %350 = vmatmul.msk.bf16.gmra.mxu0 %vm61_vm2, %v391_v8  ;;  %v251_v8 = vunpack.c.l.b16 %v241_v7 }
  0x20   :  { %v254_v9 = vpack.c.b16 %v251_v8, %v251_v8 }
  0x2e   :  { %351 = vmatmul.msk.bf16.gmra.mxu0 %vm61_vm2, %v55_v11 }
  0x8b   :  { %v87_v12 = vpop.f32.mrf.mxu0 }
  0x8c   :  { %v101_v27 = vmax.f32 %v87_v12, 0.0 }
  0x93   :  { %v89_v13 = vpop.f32.mrf.mxu0 }
  0x94   :  { %v102_v25 = vmax.f32 %v89_v13, 0.0 }
  0x96   :  { %v106_v28 = vpack.c.bf16 %v102_v25, %v101_v27 }
  0x9b   :  { %v92_v14 = vpop.f32.mrf.mxu0 }
  0x9c   :  { %v103_v23 = vmax.f32 %v92_v14, 0.0 }
  0xa3   :  { %v94_v15 = vpop.f32.mrf.mxu0 }
  0xa4   :  { %v104_v21 = vmax.f32 %v94_v15, 0.0 }
  0xa6   :  { %v107_v26 = vpack.c.bf16 %v104_v21, %v103_v23 }
  0xab   :  { %v97_v16 = vpop.f32.mrf.mxu0 }
  0xac   :  { %v105_v17 = vmax.f32 %v97_v16, 0.0 }
  0xae   :  { %v108_v20 = vpack.c.bf16 %v105_v17, %v105_v17 }
  0xb0   :  { %v141_v22 = vand.u32 %v486_v19, %v108_v20 }
  0xb2   :  { %148 = vmatpush.bf16.msra.mxu1 %v141_v22 }
  0xb3   :  { %v99_v24 = vpop.f32.mrf.mxu0 }
  0xb6   :  { %149 = vmatpush.bf16.msra.mxu1 %v107_v26  ;;  %v399_v26 = vld [vmem:[%s514_s3] sm:$0xff] }
  0xba   :  { %150 = vmatpush.bf16.msra.mxu1 %v106_v28 }
  0xbd   :  { %360 = vmatmul.msk.bf16.vlgmr.msra.gmra.mxu1 %vm127_vm4, %v393_v29 }
  0xcd   :  { %361 = vmatmul.msk.bf16.gmra.mxu1 %vm127_vm4, %v394_v30 }
  0xdd   :  { %362 = vmatmul.msk.bf16.gmra.mxu1 %vm127_vm4, %v126_v33 }
 0x13a   :  { %v152_v34 = vpop.f32.mrf.mxu1 }
 0x13b   :  { %v166_v47 = vmax.f32 %v152_v34, 0.0 }
 0x142   :  { %v154_v35 = vpop.f32.mrf.mxu1 }
 0x143   :  { %v167_v45 = vmax.f32 %v154_v35, 0.0 }
 0x145   :  { %v171_v48 = vpack.c.bf16 %v167_v45, %v166_v47 }
 0x14a   :  { %v157_v36 = vpop.f32.mrf.mxu1 }
 0x14b   :  { %v168_v43 = vmax.f32 %v157_v36, 0.0 }
 0x152   :  { %v159_v37 = vpop.f32.mrf.mxu1 }
 0x153   :  { %v169_v41 = vmax.f32 %v159_v37, 0.0 }
 0x155   :  { %v172_v46 = vpack.c.bf16 %v169_v41, %v168_v43 }
 0x15a   :  { %v162_v38 = vpop.f32.mrf.mxu1 }
 0x15b   :  { %v170_v39 = vmax.f32 %v162_v38, 0.0 }
 0x15d   :  { %v173_v40 = vpack.c.bf16 %v170_v39, %v170_v39 }
 0x15f   :  { %v203_v42 = vand.u32 %v173_v40, %v486_v19 }
 0x161   :  { %210 = vmatpush.bf16.msra.mxu2 %v203_v42 }
 0x162   :  { %v164_v44 = vpop.f32.mrf.mxu1 }
 0x165   :  { %211 = vmatpush.bf16.msra.mxu2 %v172_v46 }
 0x169   :  { %212 = vmatpush.bf16.msra.mxu2 %v171_v48 }
 0x16c   :  { %371 = vmatmul.msk.bf16.vlgmr.msra.gmra.mxu2 %vm127_vm4, %v395_v49 }
 0x17c   :  { %372 = vmatmul.msk.bf16.gmra.mxu2 %vm127_vm4, %v396_v50 }
 0x18c   :  { %373 = vmatmul.msk.bf16.gmra.mxu2 %vm127_vm4, %v192_v53 }
 0x1ef   :  { %v214_v54 = vpop.f32.mrf.mxu2 }
 0x1f0   :  { %v228_v3 = vmax.f32 %v214_v54, 0.0 }
 0x1f7   :  { %v216_v55 = vpop.f32.mrf.mxu2 }
 0x1f8   :  { %v229_v1 = vmax.f32 %v216_v55, 0.0 }
 0x1fa   :  { %v233_v4 = vpack.c.bf16 %v229_v1, %v228_v3 }
 0x1ff   :  { %v219_v56 = vpop.f32.mrf.mxu2 }
 0x200   :  { %v230_v63 = vmax.f32 %v219_v56, 0.0 }
 0x207   :  { %v221_v57 = vpop.f32.mrf.mxu2 }
 0x208   :  { %v231_v61 = vmax.f32 %v221_v57, 0.0 }
 0x20a   :  { %v234_v2 = vpack.c.bf16 %v231_v61, %v230_v63 }
 0x20f   :  { %v224_v58 = vpop.f32.mrf.mxu2 }
 0x210   :  { %v232_v59 = vmax.f32 %v224_v58, 0.0 }
 0x212   :  { %v235_v60 = vpack.c.bf16 %v232_v59, %v232_v59 }
 0x214   :  { %v265_v62 = vand.u32 %v235_v60, %v486_v19 }
 0x216   :  { %272 = vmatpush.bf16.msra.mxu3 %v265_v62 }
 0x217   :  { %v226_v0 = vpop.f32.mrf.mxu2 }
 0x21a   :  { %273 = vmatpush.bf16.msra.mxu3 %v234_v2 }
 0x21e   :  { %274 = vmatpush.bf16.msra.mxu3 %v233_v4 }
 0x221   :  { %382 = vmatmul.msk.bf16.vlgmr.msra.gmra.mxu3 %vm127_vm4, %v397_v5 }
 0x231   :  { %383 = vmatmul.msk.bf16.gmra.mxu3 %vm127_vm4, %v398_v6 }
 0x241   :  { %384 = vmatmul.msk.bf16.gmra.mxu3 %vm127_vm4, %v254_v9 }
 0x2a4   :  { %v276_v10 = vpop.f32.mrf.mxu3 }
 0x2a5   :  { %v290_v24 = vmax.f32 %v276_v10, 0.0 }
 0x2ac   :  { %v278_v11 = vpop.f32.mrf.mxu3 }
 0x2ad   :  { %v291_v22 = vmax.f32 %v278_v11, 0.0 }
 0x2af   :  { %v295_v25 = vpack.c.bf16 %v291_v22, %v290_v24 }
 0x2b4   :  { %v281_v12 = vpop.f32.mrf.mxu3 }
 0x2b5   :  { %v292_v20 = vmax.f32 %v281_v12, 0.0 }
 0x2bc   :  { %v283_v13 = vpop.f32.mrf.mxu3 }
 0x2bd   :  { %v293_v17 = vmax.f32 %v283_v13, 0.0 }
 0x2bf   :  { %v296_v23 = vpack.c.bf16 %v293_v17, %v292_v20 }
 0x2c4   :  { %v286_v14 = vpop.f32.mrf.mxu3 }
 0x2c5   :  { %v294_v15 = vmax.f32 %v286_v14, 0.0 }
 0x2c7   :  { %v297_v16 = vpack.c.bf16 %v294_v15, %v294_v15 }
 0x2c9   :  { %v309_v18 = vand.u32 %v297_v16, %v486_v19 }
 0x2cb   :  { %316 = vmatpush.bf16.msrb.mxu0 %v309_v18 }
 0x2cc   :  { %v288_v21 = vpop.f32.mrf.mxu3 }
 0x2cf   :  { %317 = vmatpush.bf16.msrb.mxu0 %v296_v23 }
 0x2d3   :  { %318 = vmatpush.bf16.msrb.mxu0 %v295_v25 }
 0x2d6   :  { %389 = vmatmul.msk.bf16.vlgmr.msrb.gmra.mxu0 %vm127_vm4, %v399_v26 }
 0x353   :  { %v320_v27 = vpop.f32.mrf.mxu0 }
 0x354   :  { %325 = vst [vmem:[%s515_s4] sm:$0xff] %v320_v27 }
 0x35b   :  { %v322_v19 = vpop.f32.mrf.mxu0 }
 0x35c   :  { %405 = vtanh.f32 %v322_v19 }
 0x362   :  { %v406_v28 = vpop.eup %405 }
 0x363   :  { %327 = vst [vmem:[%s516_s5] sm:$0xff] %v406_v28 }
 0x364   :  { %336 = vsyncpa [#allocation3], 1 }

</bundles_post_ra>
